<compile_context>
chip_gen: v7x
topology: tpu7x:2x2x1
jax: 0.10.0
libtpu: 0.0.40
codegen_flags: <defaults>
</compile_context>

<pallas_src>
import functools

import jax
import jax.numpy as jnp
from jax.experimental import pallas as pl
from jax.experimental.pallas import tpu as pltpu


def _round_up(n: int, m: int) -> int:
    return ((n + m - 1) // m) * m


def _cdiv(a: int, b: int) -> int:
    return (a + b - 1) // b


def _pad2d(a, rows: int, cols: int):
    return jnp.pad(a, ((0, rows - a.shape[0]), (0, cols - a.shape[1])))


def mlp_tanh_kernel(x_ref, w1_ref, w2_ref, w3_ref, o_ref):
    """One batch tile: 3x (matmul + tanh).

    Weights are pre-transposed to (in, out), so every matmul is the standard
    (M,K)x(K,N) MXU path (no RHS transpose).  f32 accumulation + f32 tanh.
    """
    x = x_ref[...].astype(w1_ref.dtype)          # in-kernel cast, no wrapper copy
    h = jnp.tanh(jnp.dot(x, w1_ref[...], preferred_element_type=jnp.float32))
    h = jnp.tanh(jnp.dot(h.astype(w2_ref.dtype), w2_ref[...],
                         preferred_element_type=jnp.float32))
    o = jnp.tanh(jnp.dot(h.astype(w3_ref.dtype), w3_ref[...],
                         preferred_element_type=jnp.float32))
    o_ref[...] = o.astype(o_ref.dtype)


@functools.partial(
    jax.jit, static_argnames=("tb", "min_tiles", "compute_dtype", "out_dtype"))
def fully_connected_tanh_2(x, w1, w2, w3, *, tb=512, min_tiles=2,
                           compute_dtype=jnp.bfloat16, out_dtype=jnp.float32):
    """Forward pass of FullyConnected_tanh_2.

    x  : (B, ...) — flattened to (B, input_dim), matches PyTorch x.view(B, -1)
    w1 : (width, input_dim)   PyTorch nn.Linear weight layout (out, in)
    w2 : (width, width)
    w3 : (num_classes, width)
    Returns (B, num_classes) in out_dtype (default float32).
    """
    B = x.shape[0]
    x2d = x.reshape(B, -1)
    D = x2d.shape[1]
    W = w1.shape[0]
    C = w3.shape[0]
    assert w1.shape == (W, D) and w2.shape == (W, W) and w3.shape == (C, W)

    # Per-layer output (lane) dims padded to 128 for lane-dense, unmasked
    # stores; contraction dims stay un-padded (full-extent block dims).
    Wp = _round_up(W, 128)
    Cp = _round_up(C, 128)

    # --- batch tiling: pick tile COUNT first, then the tile size ------------
    nt = _cdiv(B, tb)
    if nt < min_tiles and B >= 8 * min_tiles:
        nt = min_tiles                      # >= 2 steps so both v7x TCs get work
    TB = _round_up(_cdiv(B, nt), 8)
    nt = _cdiv(B, TB)
    Bp = nt * TB                            # minimal batch padding (< 8*nt rows)

    xp = x2d if Bp == B else jnp.pad(x2d, ((0, Bp - B), (0, 0)))

    # Weights: transpose to (in, out) once, pad lane dims, cast to MXU dtype.
    # (For a real model, do this at parameter-init time; under jit it fuses and
    # is negligible next to streaming x.)
    w1t = _pad2d(w1.T.astype(compute_dtype), D, Wp)      # (D,  Wp)
    w2t = _pad2d(w2.T.astype(compute_dtype), Wp, Wp)     # (Wp, Wp)
    w3t = _pad2d(w3.T.astype(compute_dtype), Wp, Cp)     # (Wp, Cp)

    x_bytes = xp.dtype.itemsize
    w_bytes = jnp.dtype(compute_dtype).itemsize
    o_bytes = jnp.dtype(out_dtype).itemsize

    # VMEM plan: double-buffered x/out tiles + (double-allocated) resident
    # weights + f32 intermediates.  Clamp the scoped limit to the 32..64 MiB
    # window valid on every generation (v5e default 16 MiB, v7x physical 64).
    est = (2 * TB * D * x_bytes
           + 2 * (D * Wp + Wp * Wp + Wp * Cp) * w_bytes
           + 2 * TB * Cp * o_bytes
           + 4 * TB * Wp * 4)
    vmem_limit = int(min(max(2 * est, 32 * 1024 * 1024), 64 * 1024 * 1024))

    cost = pl.CostEstimate(
        flops=2 * Bp * (D * Wp + Wp * Wp + Wp * Cp),
        transcendentals=Bp * (2 * Wp + Cp),
        bytes_accessed=(Bp * D * x_bytes
                        + (D * Wp + Wp * Wp + Wp * Cp) * w_bytes
                        + Bp * Cp * o_bytes),
    )

    out_padded = pl.pallas_call(
        mlp_tanh_kernel,
        out_shape=jax.ShapeDtypeStruct((Bp, Cp), out_dtype),
        grid=(nt,),
        in_specs=[
            # x tile streams with the grid (double-buffered); last dim is the
            # full array extent, so no 128-padding of the feature axis.
            pl.BlockSpec((TB, D), lambda i: (i, 0)),
            # Weights: constant block index -> fetched once, VMEM-resident.
            # TODO(synk): pipeline_mode=pl.Buffered(1) to halve their VMEM
            # footprint on v7x once width reaches the few-thousand range.
            pl.BlockSpec((D, Wp), lambda i: (0, 0)),
            pl.BlockSpec((Wp, Wp), lambda i: (0, 0)),
            pl.BlockSpec((Wp, Cp), lambda i: (0, 0)),
        ],
        out_specs=pl.BlockSpec((TB, Cp), lambda i: (i, 0)),
        compiler_params=pltpu.CompilerParams(
            dimension_semantics=("parallel",),
            vmem_limit_bytes=vmem_limit,
        ),
        cost_estimate=cost,
    )(xp, w1t, w2t, w3t)

    return out_padded[:B, :C]


def _torch_like_linear_init(key, out_features, in_features):
    # PyTorch nn.Linear default: U(-1/sqrt(in), 1/sqrt(in)), weight shape (out, in)
    bound = 1.0 / (in_features ** 0.5)
    return jax.random.uniform(
        key, (out_features, in_features), dtype=jnp.float32,
        minval=-bound, maxval=bound,
    )


def reference_forward(x, w1, w2, w3):
    # Pure-JAX f32 reference of the PyTorch module forward.
    B = x.shape[0]
    h = x.reshape(B, -1).astype(jnp.float32)
    h = jnp.tanh(h @ w1.T)
    h = jnp.tanh(h @ w2.T)
    h = jnp.tanh(h @ w3.T)
    return h


if __name__ == "__main__":
    # Small shapes consistent with the module (flattened image -> tanh MLP).
    # The kernel is structured for real sizes (input_dim=784, width>=50,
    # B in the hundreds/thousands) where tiling / resident weights pay off.
    batch = 2
    input_dim = 8 * 8          # stands in for 28*28
    width = 32                 # stands in for 50
    num_classes = 10
    # depth = 3  -> exactly one hidden (width x width) layer

    key = jax.random.PRNGKey(0)
    kx, k1, k2, k3 = jax.random.split(key, 4)

    x = jax.random.normal(kx, (batch, 1, 8, 8), dtype=jnp.float32)
    w1 = _torch_like_linear_init(k1, width, input_dim)
    w2 = _torch_like_linear_init(k2, width, width)
    w3 = _torch_like_linear_init(k3, num_classes, width)

    out = fully_connected_tanh_2(x, w1, w2, w3)
    out = jax.block_until_ready(out)

    ref = reference_forward(x, w1, w2, w3)
    assert out.shape == (batch, num_classes), out.shape
    # bf16 MXU operands with f32 accumulation; tanh squashing keeps error small.
    assert jnp.allclose(out, ref, atol=2e-2, rtol=2e-2), (
        "mismatch vs reference: max abs err = %g"
        % float(jnp.max(jnp.abs(out - ref)))
    )

    print("KERNEL_OK")
</pallas_src>

<mosaic_0001>
module attributes {stable_mosaic.version = 11 : i64} {
  func.func @mlp_tanh_kernel(%arg0: i32, %arg1: memref<8x64xf32, #tpu.memory_space<vmem>>, %arg2: memref<64x128xbf16, #tpu.memory_space<vmem>>, %arg3: memref<128x128xbf16, #tpu.memory_space<vmem>>, %arg4: memref<128x128xbf16, #tpu.memory_space<vmem>>, %arg5: memref<8x128xf32, #tpu.memory_space<vmem>>) attributes {dimension_semantics = [#tpu.dimension_semantics<parallel>], iteration_bounds = array<i64: 1>, scalar_prefetch = 0 : i64, scratch_operands = 0 : i64, tpu.core_type = #tpu.core_type<tc>, window_params = [{transform_indices = @transform_0, window_bounds = array<i64: 8, 64>}, {pipeline_mode = #tpu.pipeline_mode<synchronous>, transform_indices = @transform_1, window_bounds = array<i64: 64, 128>}, {pipeline_mode = #tpu.pipeline_mode<synchronous>, transform_indices = @transform_2, window_bounds = array<i64: 128, 128>}, {pipeline_mode = #tpu.pipeline_mode<synchronous>, transform_indices = @transform_3, window_bounds = array<i64: 128, 128>}, {transform_indices = @transform_4, window_bounds = array<i64: 8, 128>}]} {
    %c0 = arith.constant 0 : index
    %c0_0 = arith.constant 0 : index
    %0 = vector.load %arg1[%c0, %c0_0] : memref<8x64xf32, #tpu.memory_space<vmem>>, vector<8x64xf32>
    %1 = arith.truncf %0 : vector<8x64xf32> to vector<8x64xbf16>
    %c0_1 = arith.constant 0 : index
    %c0_2 = arith.constant 0 : index
    %2 = vector.load %arg2[%c0_1, %c0_2] : memref<64x128xbf16, #tpu.memory_space<vmem>>, vector<64x128xbf16>
    %cst = arith.constant dense<0.000000e+00> : vector<8x128xf32>
    %3 = tpu.matmul %1, %2, %cst {dimension_numbers = #tpu.dot_dimension_numbers<[1], [0], [0], [1], [0, 0, 1, 1], [], []>} : vector<8x64xbf16>, vector<64x128xbf16>, vector<8x128xf32> -> vector<8x128xf32>
    %4 = math.tanh %3 : vector<8x128xf32>
    %5 = arith.truncf %4 : vector<8x128xf32> to vector<8x128xbf16>
    %c0_3 = arith.constant 0 : index
    %c0_4 = arith.constant 0 : index
    %6 = vector.load %arg3[%c0_3, %c0_4] : memref<128x128xbf16, #tpu.memory_space<vmem>>, vector<128x128xbf16>
    %cst_5 = arith.constant dense<0.000000e+00> : vector<8x128xf32>
    %7 = tpu.matmul %5, %6, %cst_5 {dimension_numbers = #tpu.dot_dimension_numbers<[1], [0], [0], [1], [0, 0, 1, 1], [], []>} : vector<8x128xbf16>, vector<128x128xbf16>, vector<8x128xf32> -> vector<8x128xf32>
    %8 = math.tanh %7 : vector<8x128xf32>
    %9 = arith.truncf %8 : vector<8x128xf32> to vector<8x128xbf16>
    %c0_6 = arith.constant 0 : index
    %c0_7 = arith.constant 0 : index
    %10 = vector.load %arg4[%c0_6, %c0_7] : memref<128x128xbf16, #tpu.memory_space<vmem>>, vector<128x128xbf16>
    %cst_8 = arith.constant dense<0.000000e+00> : vector<8x128xf32>
    %11 = tpu.matmul %9, %10, %cst_8 {dimension_numbers = #tpu.dot_dimension_numbers<[1], [0], [0], [1], [0, 0, 1, 1], [], []>} : vector<8x128xbf16>, vector<128x128xbf16>, vector<8x128xf32> -> vector<8x128xf32>
    %12 = math.tanh %11 : vector<8x128xf32>
    %c0_9 = arith.constant 0 : index
    %c0_10 = arith.constant 0 : index
    %13 = vector.load %arg5[%c0_9, %c0_10] : memref<8x128xf32, #tpu.memory_space<vmem>>, vector<8x128xf32>
    tpu.vector_store %arg5[%c0_9, %c0_10], %12 {strides = array<i32>} : memref<8x128xf32, #tpu.memory_space<vmem>>, vector<8x128xf32>,
    return
  }
  func.func @transform_0(%arg0: i32) -> (i32, i32) {
    %c0_i32 = arith.constant 0 : i32
    %c0_i32_0 = arith.constant 0 : i32
    return %arg0, %c0_i32 : i32, i32
  }
  func.func @transform_1(%arg0: i32) -> (i32, i32) {
    %c0_i32 = arith.constant 0 : i32
    %c0_i32_0 = arith.constant 0 : i32
    %c0_i32_1 = arith.constant 0 : i32
    return %c0_i32, %c0_i32_0 : i32, i32
  }
  func.func @transform_2(%arg0: i32) -> (i32, i32) {
    %c0_i32 = arith.constant 0 : i32
    %c0_i32_0 = arith.constant 0 : i32
    %c0_i32_1 = arith.constant 0 : i32
    return %c0_i32, %c0_i32_0 : i32, i32
  }
  func.func @transform_3(%arg0: i32) -> (i32, i32) {
    %c0_i32 = arith.constant 0 : i32
    %c0_i32_0 = arith.constant 0 : i32
    %c0_i32_1 = arith.constant 0 : i32
    return %c0_i32, %c0_i32_0 : i32, i32
  }
  func.func @transform_4(%arg0: i32) -> (i32, i32) {
    %c0_i32 = arith.constant 0 : i32
    %c0_i32_0 = arith.constant 0 : i32
    return %arg0, %c0_i32 : i32, i32
  }
}

</mosaic_0001>

<bundles_post_ra>
// kernel: fully_connected_tanh_2.1
= control target key start
LH: loop header
LB: loop body
LE: loop exit
PB: predicated region body
PF: predicated region fallthrough
CT: control target
= control target key end

     0   :  { %v438_v0 = vmov 0.0   ;;  %vm439_vm0 = vmmov 0   ;;  %vm52_vm1 = vcmask 523264   ;;  %s557_s1 = inlined_call_operand.vmem [shape: bf16[64,128], index: 1, kind: input, shape index: {}]   ;;  %s558_s2 = inlined_call_operand.vmem [shape: bf16[128,128], index: 2, kind: input, shape index: {}]   ;;  %s559_s0 = inlined_call_operand.vmem [shape: f32[8,64], index: 0, kind: input, shape index: {}]   ;;  %s560_s3 = inlined_call_operand.vmem [shape: bf16[128,128], index: 3, kind: input, shape index: {}]   ;;  %s561_s4 = inlined_call_operand.vmem [shape: f32[8,128], index: 4, kind: output, shape index: {}]  }
   0x1   :  { %358 = vmatprep.subr.bf16.mxu0 %v438_v0  ;;  %v412_v1 = vld [vmem:[%s557_s1] sm:$0xff]   ;;  %366 = vmatprep.mubr.msk.bf16.mxu0 %vm439_vm0, %v438_v0  ;;  %v413_v2 = vld [vmem:[%s557_s1 + $0x8] sm:$0xff]   ;;  %v414_v4 = vld [vmem:[%s557_s1 + $0x10] sm:$0xff]  }
   0x2   :  { %370 = vmatprep.subr.bf16.mxu1 %v438_v0  ;;  %386 = vmatprep.mubr.msk.bf16.mxu1 %vm439_vm0, %v438_v0  ;;  %v416_v3 = vld [vmem:[%s558_s2] sm:$0xff]   ;;  %v417_v5 = vld [vmem:[%s558_s2 + $0x8] sm:$0xff]   ;;  %v415_v6 = vld [vmem:[%s557_s1 + $0x18] sm:$0xff]  }
   0x3   :  { %359 = vmatpush3.bf16.msra.mxu0 %v412_v1  ;;  %371 = vmatpush3.bf16.msra.mxu1 %v416_v3  ;;  %v18_v7 = vld [vmem:[%s559_s0] sm:$0xff]  ;;  %v418_v8 = vld [vmem:[%s558_s2 + $0x10] sm:$0xff]   ;;  %v419_v10 = vld [vmem:[%s558_s2 + $0x18] sm:$0xff]  }
   0x4   :  { %360 = vmatprep.subr.bf16.mxu0 %v438_v0  ;;  %372 = vmatprep.subr.bf16.mxu1 %v438_v0  ;;  %v19_v9 = vpack.c.bf16 %v18_v7, %v18_v7  ;;  %v420_v11 = vld [vmem:[%s558_s2 + $0x20] sm:$0xff]   ;;  %v421_v12 = vld [vmem:[%s558_s2 + $0x28] sm:$0xff]   ;;  %v422_v13 = vld [vmem:[%s558_s2 + $0x30] sm:$0xff]  }
   0x5   :  { %v423_v14 = vld [vmem:[%s558_s2 + $0x38] sm:$0xff]   ;;  %v424_v15 = vld [vmem:[%s560_s3] sm:$0xff]   ;;  %v425_v16 = vld [vmem:[%s560_s3 + $0x8] sm:$0xff]  }
   0x6   :  { %v426_v17 = vld [vmem:[%s560_s3 + $0x10] sm:$0xff]   ;;  %v427_v18 = vld [vmem:[%s560_s3 + $0x18] sm:$0xff]   ;;  %v428_v19 = vld [vmem:[%s560_s3 + $0x20] sm:$0xff]  }
   0x7   :  { %361 = vmatpush3.bf16.msra.mxu0 %v413_v2  ;;  %373 = vmatpush3.bf16.msra.mxu1 %v417_v5  ;;  %v429_v26 = vld [vmem:[%s560_s3 + $0x28] sm:$0xff]   ;;  %v430_v27 = vld [vmem:[%s560_s3 + $0x30] sm:$0xff]   ;;  %v431_v28 = vld [vmem:[%s560_s3 + $0x38] sm:$0xff]  }
   0x8   :  { %362 = vmatprep.subr.bf16.mxu0 %v438_v0  ;;  %374 = vmatprep.subr.bf16.mxu1 %v438_v0 }
   0xb   :  { %363 = vmatpush3.bf16.msra.mxu0 %v414_v4  ;;  %375 = vmatpush3.bf16.msra.mxu1 %v418_v8 }
   0xc   :  { %364 = vmatprep.subr.bf16.mxu0 %v438_v0  ;;  %376 = vmatprep.subr.bf16.mxu1 %v438_v0 }
   0xf   :  { %365 = vmatpush3.bf16.msra.mxu0 %v415_v6  ;;  %377 = vmatpush3.bf16.msra.mxu1 %v419_v10 }
  0x10   :  { %390 = vmatprep.subr.bf16.mxu0 %v438_v0  ;;  %378 = vmatprep.subr.bf16.mxu1 %v438_v0 }
  0x12   :  { %367 = vmatmul.mubr.msk.bf16.vlgmr.msra.gmra.mrb[0].mxu0 %vm52_vm1, %v19_v9 }
  0x13   :  { %406 = vmatprep.mubr.msk.bf16.mxu0 %vm439_vm0, %v438_v0  ;;  %379 = vmatpush3.bf16.msra.mxu1 %v420_v11 }
  0x14   :  { %380 = vmatprep.subr.bf16.mxu1 %v438_v0  ;;  %391 = vmatpush3.bf16.msra.mxu0 %v424_v15 }
  0x15   :  { %392 = vmatprep.subr.bf16.mxu0 %v438_v0 }
  0x17   :  { %381 = vmatpush3.bf16.msra.mxu1 %v421_v12 }
  0x18   :  { %382 = vmatprep.subr.bf16.mxu1 %v438_v0  ;;  %393 = vmatpush3.bf16.msra.mxu0 %v425_v16 }
  0x19   :  { %394 = vmatprep.subr.bf16.mxu0 %v438_v0 }
  0x1b   :  { %383 = vmatpush3.bf16.msra.mxu1 %v422_v13 }
  0x1c   :  { %384 = vmatprep.subr.bf16.mxu1 %v438_v0  ;;  %395 = vmatpush3.bf16.msra.mxu0 %v426_v17 }
  0x1d   :  { %396 = vmatprep.subr.bf16.mxu0 %v438_v0 }
  0x1f   :  { %385 = vmatpush3.bf16.msra.mxu1 %v423_v14 }
  0x20   :  { %397 = vmatpush3.bf16.msra.mxu0 %v427_v18 }
  0x21   :  { %398 = vmatprep.subr.bf16.mxu0 %v438_v0 }
  0x24   :  { %399 = vmatpush3.bf16.msra.mxu0 %v428_v19 }
  0x25   :  { %400 = vmatprep.subr.bf16.mxu0 %v438_v0 }
  0x28   :  { %401 = vmatpush3.bf16.msra.mxu0 %v429_v26 }
  0x29   :  { %402 = vmatprep.subr.bf16.mxu0 %v438_v0 }
  0x2c   :  { %403 = vmatpush3.bf16.msra.mxu0 %v430_v27 }
  0x2d   :  { %404 = vmatprep.subr.bf16.mxu0 %v438_v0 }
  0x30   :  { %405 = vmatpush3.bf16.msra.mxu0 %v431_v28 }
  0xe5   :  { %v90_v20 = vpop.f32.mrb[0].mxu0 }
  0xe6   :  { %432 = vtanh.f32 %v90_v20  ;;  %v368_v21 = vpop.f32.mrb[1].mxu0 }
  0xe7   :  { %v93_v22 = vpop.f32.mrb[2].mxu0 }
  0xe8   :  { %v369_v23 = vpop.f32.mrb[3].mxu0 }
  0xf0   :  { %v433_v24 = vpop.eup %432 }
  0xf1   :  { %v97_v25 = vpack.c.bf16 %v433_v24, %v433_v24 }
  0xf3   :  { %387 = vmatmul.mubr.bf16.vlgmr.msra.gmra.mrb[0].mxu1 %v97_v25 }
 0x1c6   :  { %v196_v29 = vpop.f32.mrb[0].mxu1 }
 0x1c7   :  { %434 = vtanh.f32 %v196_v29  ;;  %v388_v30 = vpop.f32.mrb[1].mxu1 }
 0x1c8   :  { %v199_v31 = vpop.f32.mrb[2].mxu1 }
 0x1c9   :  { %v389_v32 = vpop.f32.mrb[3].mxu1 }
 0x1d1   :  { %v435_v33 = vpop.eup %434 }
 0x1d2   :  { %v203_v34 = vpack.c.bf16 %v435_v33, %v435_v33 }
 0x1d4   :  { %407 = vmatmul.mubr.bf16.vlgmr.msra.gmra.mrb[4].mxu0 %v203_v34 }
 0x2a7   :  { %v302_v35 = vpop.f32.mrb[4].mxu0 }
 0x2a8   :  { %436 = vtanh.f32 %v302_v35  ;;  %v408_v36 = vpop.f32.mrb[5].mxu0 }
 0x2a9   :  { %v305_v37 = vpop.f32.mrb[6].mxu0 }
 0x2aa   :  { %v409_v38 = vpop.f32.mrb[7].mxu0 }
 0x2b2   :  { %v437_v39 = vpop.eup %436 }
 0x2b3   :  { %309 = vst [vmem:[%s561_s4] sm:$0xff] %v437_v39 }

</bundles_post_ra>
